<compile_context>
chip_gen: v7x
topology: tpu7x:2x2x1
jax: 0.10.0
libtpu: 0.0.40
codegen_flags: <defaults>
</compile_context>

<pallas_src>
import functools

import jax
import jax.numpy as jnp
import numpy as np
from jax.experimental import pallas as pl
from jax.experimental.pallas import tpu as pltpu


def _droppath_kernel(x_ref, scale_ref, o_ref):
    # x_ref: (TB, TN) activation tile; scale_ref: (TB, 1) f32 per-sample
    # keep_mask / keep_prob. Multiply in f32 (promotion), cast once at store.
    o_ref[...] = (x_ref[...] * scale_ref[...]).astype(o_ref.dtype)


def _round_up(v, m):
    return (v + m - 1) // m * m


def _tile_sizes(B, n, dtype):
    """Pick (TB, TN): lane-dense, (sub,128)-legal, ~2 MiB blocks, balanced tail."""
    itemsize = jnp.dtype(dtype).itemsize
    # Native packed sublane tiling: f32 -> 8 rows, bf16/f16 -> 16, int8/fp8 -> 32.
    sub = 32 if itemsize == 1 else (16 if itemsize == 2 else 8)
    target = 2 << 20  # ~2 MiB per block

    # ---- feature axis ----
    if n <= 128:
        TN = n                       # full feature dim (legal: equals array dim)
        n_blocks = 1
    else:
        n128 = pl.cdiv(n, 128)       # feature extent in lanes-of-128
        max_lanes = max(1, target // (sub * itemsize * 128))
        n_blocks = pl.cdiv(n128, max_lanes)
        if n_blocks == 1:
            TN = n                   # single block: exact dim, no padding games
        else:
            # Balance blocks so the tail isn't a tiny masked-store sliver.
            TN = pl.cdiv(n128, n_blocks) * 128
            n_blocks = pl.cdiv(n, TN)

    # ---- batch axis ----
    if B <= sub:
        TB = B                       # full batch dim (legal: equals array dim)
    elif n_blocks > 1:
        TB = sub                     # feature blocks are already ~target-sized
    else:
        # Grow TB (multiples of `sub`) until the block reaches the byte target.
        rows = max(sub, (target // max(1, TN * itemsize)) // sub * sub)
        TB = B if rows >= B else rows

    # ---- megacore: guarantee >=2 blocks on a parallel axis for big tensors ----
    total_bytes = B * n * itemsize
    if pl.cdiv(B, TB) == 1 and pl.cdiv(n, TN) == 1 and total_bytes >= (1 << 20):
        if n > 256:
            TN = pl.cdiv(pl.cdiv(n, 128), 2) * 128        # split feature axis
        elif B > sub:
            TB = max(sub, _round_up(pl.cdiv(B, 2), sub))  # split batch axis

    return TB, TN


@functools.partial(jax.jit, static_argnames=("drop_prob", "training"))
def drop_path(x, key, *, drop_prob: float, training: bool = True):
    """Pallas DropPath forward. x: (B, ...) any rank >= 1."""
    if drop_prob <= 0.0 or not training:
        return x
    keep_prob = 1.0 - drop_prob
    if keep_prob <= 0.0:
        # Everything dropped; PyTorch would emit NaN via div(0). Return zeros.
        return jnp.zeros_like(x)

    B = x.shape[0]
    orig_shape = x.shape
    n = int(np.prod(orig_shape[1:])) if x.ndim > 1 else 1

    # Per-sample Bernoulli keep mask fused with 1/keep_prob: tiny (B,) f32
    # vector, generated in plain JAX (not the hot path).
    u = jax.random.uniform(key, (B,), dtype=jnp.float32)
    scale = (u < keep_prob).astype(jnp.float32) / jnp.float32(keep_prob)

    if n == 1 or x.ndim == 1:
        # Degenerate lane-width-1 case: a dedicated kernel would only do masked
        # single-lane stores; let XLA fuse the broadcast multiply instead.
        y = x.reshape(B, n).astype(jnp.float32) * scale.reshape(B, 1)
        return y.astype(x.dtype).reshape(orig_shape)

    scale2 = scale.reshape(B, 1)
    x2 = x.reshape(B, n)          # contiguous reshape: free, no pad/slice passes
    TB, TN = _tile_sizes(B, n, x.dtype)
    grid = (pl.cdiv(B, TB), pl.cdiv(n, TN))

    itemsize = jnp.dtype(x.dtype).itemsize
    block_bytes = TB * TN * itemsize
    # Double-buffered in + out (~4x block) plus scale; stay inside v7x's 64 MiB.
    vmem_limit = int(min(48 << 20, max(32 << 20, 6 * block_bytes)))

    out2 = pl.pallas_call(
        _droppath_kernel,
        out_shape=jax.ShapeDtypeStruct((B, n), x.dtype),
        grid=grid,
        in_specs=[
            pl.BlockSpec((TB, TN), lambda bi, ni: (bi, ni)),
            pl.BlockSpec((TB, 1), lambda bi, ni: (bi, 0)),
        ],
        out_specs=pl.BlockSpec((TB, TN), lambda bi, ni: (bi, ni)),
        # DropPath is safely in-place; donate x at the call site to realize the
        # footprint win (XLA copies defensively if x isn't donated).
        input_output_aliases={0: 0},
        cost_estimate=pl.CostEstimate(
            flops=B * n,
            transcendentals=0,
            bytes_accessed=2 * B * n * itemsize + 4 * B),
        compiler_params=pltpu.CompilerParams(
            dimension_semantics=("parallel", "parallel"),
            vmem_limit_bytes=vmem_limit),
    )(x2, scale2)

    return out2.reshape(orig_shape)


class DropPath:
    """Thin wrapper mirroring the PyTorch module interface."""

    def __init__(self, drop_prob=None):
        self.drop_prob = float(drop_prob)
        self.training = True

    def __call__(self, x, key):
        return drop_path(x, key, drop_prob=self.drop_prob, training=self.training)


if __name__ == "__main__":
    root = jax.random.PRNGKey(0)
    k_x, k_mask, k_x2, k_mask2, k_x3, k_mask3 = jax.random.split(root, 6)

    # Small NCHW feature map consistent with how DropPath is used.
    B, C, H, W = 2, 4, 16, 16
    x = jax.random.normal(k_x, (B, C, H, W), dtype=jnp.float32)

    module = DropPath(drop_prob=0.5)
    out = jax.block_until_ready(module(x, k_mask))

    # Pure-JAX reference for the same mask draw (keep_prob=0.5 -> exact scale).
    keep_prob = 1.0 - module.drop_prob
    keep_mask = (jax.random.uniform(k_mask, (B,), dtype=jnp.float32) < keep_prob
                 ).astype(jnp.float32)
    ref = x / keep_prob * keep_mask.reshape(B, 1, 1, 1)
    np.testing.assert_allclose(np.asarray(out), np.asarray(ref), rtol=1e-6, atol=1e-6)

    # Ragged feature size (n = 210, not a multiple of 128) exercises the
    # partial-edge-block path.
    B2 = 3
    x_ragged = jax.random.normal(k_x2, (B2, 5, 7, 6), dtype=jnp.float32)
    out_ragged = jax.block_until_ready(drop_path(x_ragged, k_mask2, drop_prob=0.25))
    km2 = (jax.random.uniform(k_mask2, (B2,), dtype=jnp.float32) < 0.75
           ).astype(jnp.float32)
    ref_ragged = x_ragged / 0.75 * km2.reshape(B2, 1, 1, 1)
    np.testing.assert_allclose(np.asarray(out_ragged), np.asarray(ref_ragged),
                               rtol=1e-6, atol=1e-6)

    # (B, D) transformer-residual shape exercises the grown batch tile
    # (TB = B = 16 rather than the old 8-row cap).
    B3, D3 = 16, 2048
    x_res = jax.random.normal(k_x3, (B3, D3), dtype=jnp.float32)
    out_res = jax.block_until_ready(drop_path(x_res, k_mask3, drop_prob=0.5))
    km3 = (jax.random.uniform(k_mask3, (B3,), dtype=jnp.float32) < 0.5
           ).astype(jnp.float32)
    ref_res = x_res / 0.5 * km3.reshape(B3, 1)
    np.testing.assert_allclose(np.asarray(out_res), np.asarray(ref_res),
                               rtol=1e-6, atol=1e-6)

    # Eval / drop_prob<=0 path is identity.
    module.training = False
    out_eval = jax.block_until_ready(module(x, k_mask))
    np.testing.assert_allclose(np.asarray(out_eval), np.asarray(x))

    print("KERNEL_OK")
</pallas_src>

<mosaic_0001>
module attributes {stable_mosaic.version = 11 : i64} {
  func.func @_droppath_kernel(%arg0: i32, %arg1: i32, %arg2: memref<2x1024xf32, #tpu.memory_space<vmem>>, %arg3: memref<2x1xf32, #tpu.memory_space<vmem>>, %arg4: memref<2x1024xf32, #tpu.memory_space<vmem>>) attributes {dimension_semantics = [#tpu.dimension_semantics<parallel>, #tpu.dimension_semantics<parallel>], iteration_bounds = array<i64: 1, 1>, scalar_prefetch = 0 : i64, scratch_operands = 0 : i64, tpu.core_type = #tpu.core_type<tc>, window_params = [{transform_indices = @transform_0, window_bounds = array<i64: 2, 1024>}, {transform_indices = @transform_1, window_bounds = array<i64: 2, 1>}, {transform_indices = @transform_2, window_bounds = array<i64: 2, 1024>}]} {
    %c0 = arith.constant 0 : index
    %c0_0 = arith.constant 0 : index
    %0 = vector.load %arg2[%c0, %c0_0] : memref<2x1024xf32, #tpu.memory_space<vmem>>, vector<2x1024xf32>
    %c0_1 = arith.constant 0 : index
    %c0_2 = arith.constant 0 : index
    %1 = vector.load %arg3[%c0_1, %c0_2] : memref<2x1xf32, #tpu.memory_space<vmem>>, vector<2x1xf32>
    %2 = vector.broadcast %1 : vector<2x1xf32> to vector<2x1024xf32>
    %3 = arith.mulf %0, %2 : vector<2x1024xf32>
    %c0_3 = arith.constant 0 : index
    %c0_4 = arith.constant 0 : index
    %4 = vector.load %arg4[%c0_3, %c0_4] : memref<2x1024xf32, #tpu.memory_space<vmem>>, vector<2x1024xf32>
    tpu.vector_store %arg4[%c0_3, %c0_4], %3 {strides = array<i32>} : memref<2x1024xf32, #tpu.memory_space<vmem>>, vector<2x1024xf32>,
    return
  }
  func.func @transform_0(%arg0: i32, %arg1: i32) -> (i32, i32) {
    %c0_i32 = arith.constant 0 : i32
    return %arg0, %arg1 : i32, i32
  }
  func.func @transform_1(%arg0: i32, %arg1: i32) -> (i32, i32) {
    %c0_i32 = arith.constant 0 : i32
    %c0_i32_0 = arith.constant 0 : i32
    return %arg0, %c0_i32 : i32, i32
  }
  func.func @transform_2(%arg0: i32, %arg1: i32) -> (i32, i32) {
    %c0_i32 = arith.constant 0 : i32
    return %arg0, %arg1 : i32, i32
  }
}

</mosaic_0001>

<bundles_post_ra>
// kernel: drop_path.1
= control target key start
LH: loop header
LB: loop body
LE: loop exit
PB: predicated region body
PF: predicated region fallthrough
CT: control target
= control target key end

     0   :  { %v37_v0 = vmov 0   ;;  %v38_v2 = vmov 269488144   ;;  %v21_v4 = vlaneseq  ;;  %s69_s1 = inlined_call_operand.vmem [shape: f32[2,1], index: 1, kind: input, shape index: {}]   ;;  %s70_s0 = inlined_call_operand.vmem [shape: f32[2,1024], index: 0, kind: input, shape index: {}, may-alias: {0,2}]   ;;  %s71_s2 = inlined_call_operand.vmem [shape: f32[2,1024], index: 2, kind: output, shape index: {}, may-alias: {0,2}]  }
   0x1   :  { %36 = vset.pattern.permute.xlu0 %v37_v0  ;;  %v13_v1 = vld [vmem:[%s69_s1] sm:$0x3]  ;;  %v19_v3 = vunpack.c.l.s4 %v38_v2  ;;  %v12_v10 = vld [vmem:[%s70_s0 + $0x8] sm:$0xff] }
   0x2   :  { %16 = vperm.xlu0 %36, %v13_v1   ;;  %v22_v6 = vshrl.u32 %v21_v4, 7  ;;  %v11_v9 = vld [vmem:[%s70_s0] sm:$0xff] }
   0x3   :  { %v20_v5 = vunpack.c.0.s8 %v19_v3 }
   0x5   :  { %v23_v7 = vsub.s32 %v20_v5, %v22_v6 }
  0x81   :  { %v17_v8 = vpop.permute.xlu0 %16 }
  0x82   :  { %v24_v11 = vrot.slane %v17_v8, %v23_v7 }
  0x84   :  { %v26_v12 = vmul.f32 %v24_v11, %v11_v9  ;;  %v27_v13 = vmul.f32 %v24_v11, %v12_v10 }
  0x86   :  { %28 = vst [vmem:[%s71_s2] sm:$0xff] %v26_v12  ;;  %29 = vst [vmem:[%s71_s2 + $0x8] sm:$0xff] %v27_v13 }

</bundles_post_ra>
